<compile_context>
chip_gen: v6e
topology: v6e:2x2x1
jax: 0.10.0
libtpu: 0.0.40
codegen_flags: <defaults>
</compile_context>

<pallas_src>
import jax
import jax.numpy as jnp
from jax.experimental import pallas as pl
from jax.experimental.pallas import tpu as pltpu


def _round_up(n, m):
    return ((n + m - 1) // m) * m


def _rnn_kernel(x_ref, wih_ref, whh_ref, b_ref, wfc_ref, bfc_ref, out_ref):
    B, T, I = x_ref.shape          # logical, unpadded input
    Hp = whh_ref.shape[0]          # lane-padded hidden size

    # ---- Prologue: hoisted input projection (one MXU matmul, off the
    # serial path).  Result stays in vregs -- no VMEM scratch round-trip.
    x_all = x_ref[...].reshape(B * T, I)                          # (B*T, I)
    xp = (jnp.dot(x_all, wih_ref[...], preferred_element_type=jnp.float32)
          + b_ref[...]).reshape(B, T, Hp)                         # (B, T, Hp)

    whh = whh_ref[...]                                            # (Hp, Hp)

    # ---- Serial recurrence: only h @ W_hh^T + tanh on the critical path.
    # T is small & static here -> full unroll with static slices of xp.
    # TODO(synk): for T >~ 32 switch to lax.fori_loop(unroll=4..8) with xp in
    # a VMEM scratch; optionally keep W_hh resident in the MXU via
    # matmul_push_rhs/acc_lhs/pop once validated per chip generation.
    h = jnp.zeros((B, Hp), jnp.float32)
    for t in range(T):
        pre = xp[:, t, :] + jnp.dot(h, whh,
                                    preferred_element_type=jnp.float32)
        h = jnp.tanh(pre)                                         # tanh -> EUP

    # ---- Epilogue: final linear layer ------------------------------------
    out_ref[...] = (
        jnp.dot(h, wfc_ref[...], preferred_element_type=jnp.float32)
        + bfc_ref[...]
    ).astype(out_ref.dtype)


def vanilla_rnn_forward(x, w_ih, w_hh, b_ih, b_hh, w_fc, b_fc):
    """x: (B, T, I) float32 (batch_first). Returns (B, O) float32."""
    B, T, I = x.shape
    H = w_ih.shape[0]
    O = w_fc.shape[0]

    Hp = _round_up(H, 128)     # lane tile
    Op = _round_up(O, 128)

    # Weight relayout (constants in a real model -> hoist / fold once).
    # Zero padding keeps padded hidden columns exactly 0 through the
    # recurrence, so the logical math is unchanged.
    wih_t = jnp.pad(jnp.transpose(w_ih), ((0, 0), (0, Hp - H)))        # (I,  Hp)
    whh_t = jnp.pad(jnp.transpose(w_hh), ((0, Hp - H), (0, Hp - H)))   # (Hp, Hp)
    b_rnn = jnp.pad((b_ih + b_hh).reshape(1, H), ((0, 0), (0, Hp - H)))  # (1, Hp)
    wfc_t = jnp.pad(jnp.transpose(w_fc), ((0, Hp - H), (0, Op - O)))   # (Hp, Op)
    bfc = jnp.pad(b_fc.reshape(1, O), ((0, 0), (0, Op - O)))           # (1, Op)

    vmem_spec = pl.BlockSpec(memory_space=pltpu.MemorySpace.VMEM)

    out_padded = pl.pallas_call(
        _rnn_kernel,
        out_shape=jax.ShapeDtypeStruct((B, Op), jnp.float32),
        in_specs=[vmem_spec] * 6,
        out_specs=vmem_spec,
    )(x.astype(jnp.float32), wih_t, whh_t, b_rnn, wfc_t, bfc)

    return out_padded[:, :O]


def _reference(x, w_ih, w_hh, b_ih, b_hh, w_fc, b_fc):
    B, _, _ = x.shape
    H = w_ih.shape[0]

    def step(h, x_t):
        h_new = jnp.tanh(x_t @ w_ih.T + b_ih + h @ w_hh.T + b_hh)
        return h_new, None

    h0 = jnp.zeros((B, H), jnp.float32)
    h_last, _ = jax.lax.scan(step, h0, jnp.transpose(x, (1, 0, 2)))
    return h_last @ w_fc.T + b_fc


if __name__ == "__main__":
    # Small shapes consistent with the module's forward.
    B, T, I, H, O = 2, 8, 16, 32, 8

    key = jax.random.PRNGKey(0)
    kx, k1, k2, k3, k4, k5, k6 = jax.random.split(key, 7)

    x = jax.random.normal(kx, (B, T, I), dtype=jnp.float32)

    # Deterministic parameter init (PyTorch-style uniform ranges).
    s_rnn = 1.0 / jnp.sqrt(H)
    s_fc = 1.0 / jnp.sqrt(H)
    w_ih = jax.random.uniform(k1, (H, I), jnp.float32, -s_rnn, s_rnn)
    w_hh = jax.random.uniform(k2, (H, H), jnp.float32, -s_rnn, s_rnn)
    b_ih = jax.random.uniform(k3, (H,), jnp.float32, -s_rnn, s_rnn)
    b_hh = jax.random.uniform(k4, (H,), jnp.float32, -s_rnn, s_rnn)
    w_fc = jax.random.uniform(k5, (O, H), jnp.float32, -s_fc, s_fc)
    b_fc = jax.random.uniform(k6, (O,), jnp.float32, -s_fc, s_fc)

    # jit the wrapper so the (tiny, constant) weight relayout ops and the
    # final slice fuse into one executable around the Pallas kernel.
    fwd = jax.jit(vanilla_rnn_forward)

    out = fwd(x, w_ih, w_hh, b_ih, b_hh, w_fc, b_fc)
    out = jax.block_until_ready(out)

    ref = _reference(x, w_ih, w_hh, b_ih, b_hh, w_fc, b_fc)
    assert out.shape == (B, O)
    assert jnp.allclose(out, ref, atol=1e-5, rtol=1e-5), (out, ref)

    print("KERNEL_OK")
</pallas_src>

<mosaic_0001>
module attributes {stable_mosaic.version = 11 : i64} {
  func.func @_rnn_kernel(%arg0: memref<2x8x16xf32, #tpu.memory_space<vmem>>, %arg1: memref<16x128xf32, #tpu.memory_space<vmem>>, %arg2: memref<128x128xf32, #tpu.memory_space<vmem>>, %arg3: memref<1x128xf32, #tpu.memory_space<vmem>>, %arg4: memref<128x128xf32, #tpu.memory_space<vmem>>, %arg5: memref<1x128xf32, #tpu.memory_space<vmem>>, %arg6: memref<2x128xf32, #tpu.memory_space<vmem>>) attributes {dimension_semantics = [], scalar_prefetch = 0 : i64, scratch_operands = 0 : i64, tpu.core_type = #tpu.core_type<tc>} {
    %c0 = arith.constant 0 : index
    %c0_0 = arith.constant 0 : index
    %c0_1 = arith.constant 0 : index
    %0 = vector.load %arg0[%c0, %c0_0, %c0_1] : memref<2x8x16xf32, #tpu.memory_space<vmem>>, vector<2x8x16xf32>
    %1 = vector.shape_cast %0 : vector<2x8x16xf32> to vector<16x16xf32>
    %c0_2 = arith.constant 0 : index
    %c0_3 = arith.constant 0 : index
    %2 = vector.load %arg1[%c0_2, %c0_3] : memref<16x128xf32, #tpu.memory_space<vmem>>, vector<16x128xf32>
    %cst = arith.constant dense<0.000000e+00> : vector<16x128xf32>
    %3 = tpu.matmul %1, %2, %cst {dimension_numbers = #tpu.dot_dimension_numbers<[1], [0], [0], [1], [0, 0, 1, 1], [], []>} : vector<16x16xf32>, vector<16x128xf32>, vector<16x128xf32> -> vector<16x128xf32>
    %c0_4 = arith.constant 0 : index
    %c0_5 = arith.constant 0 : index
    %4 = vector.load %arg3[%c0_4, %c0_5] : memref<1x128xf32, #tpu.memory_space<vmem>>, vector<1x128xf32>
    %5 = vector.broadcast %4 : vector<1x128xf32> to vector<16x128xf32>
    %6 = arith.addf %3, %5 : vector<16x128xf32>
    %7 = vector.shape_cast %6 : vector<16x128xf32> to vector<2x8x128xf32>
    %c0_6 = arith.constant 0 : index
    %c0_7 = arith.constant 0 : index
    %8 = vector.load %arg2[%c0_6, %c0_7] : memref<128x128xf32, #tpu.memory_space<vmem>>, vector<128x128xf32>
    %cst_8 = arith.constant 0.000000e+00 : f32
    %9 = vector.broadcast %cst_8 : f32 to vector<2x128xf32>
    %10 = vector.extract_strided_slice %7 {offsets = [0, 0, 0], sizes = [2, 1, 128], strides = [1, 1, 1]} : vector<2x8x128xf32> to vector<2x1x128xf32>
    %11 = vector.shape_cast %10 : vector<2x1x128xf32> to vector<2x128xf32>
    %cst_9 = arith.constant dense<0.000000e+00> : vector<2x128xf32>
    %12 = tpu.matmul %9, %8, %cst_9 {dimension_numbers = #tpu.dot_dimension_numbers<[1], [0], [0], [1], [0, 0, 1, 1], [], []>} : vector<2x128xf32>, vector<128x128xf32>, vector<2x128xf32> -> vector<2x128xf32>
    %13 = arith.addf %11, %12 : vector<2x128xf32>
    %14 = math.tanh %13 : vector<2x128xf32>
    %15 = vector.extract_strided_slice %7 {offsets = [0, 1, 0], sizes = [2, 1, 128], strides = [1, 1, 1]} : vector<2x8x128xf32> to vector<2x1x128xf32>
    %16 = vector.shape_cast %15 : vector<2x1x128xf32> to vector<2x128xf32>
    %cst_10 = arith.constant dense<0.000000e+00> : vector<2x128xf32>
    %17 = tpu.matmul %14, %8, %cst_10 {dimension_numbers = #tpu.dot_dimension_numbers<[1], [0], [0], [1], [0, 0, 1, 1], [], []>} : vector<2x128xf32>, vector<128x128xf32>, vector<2x128xf32> -> vector<2x128xf32>
    %18 = arith.addf %16, %17 : vector<2x128xf32>
    %19 = math.tanh %18 : vector<2x128xf32>
    %20 = vector.extract_strided_slice %7 {offsets = [0, 2, 0], sizes = [2, 1, 128], strides = [1, 1, 1]} : vector<2x8x128xf32> to vector<2x1x128xf32>
    %21 = vector.shape_cast %20 : vector<2x1x128xf32> to vector<2x128xf32>
    %cst_11 = arith.constant dense<0.000000e+00> : vector<2x128xf32>
    %22 = tpu.matmul %19, %8, %cst_11 {dimension_numbers = #tpu.dot_dimension_numbers<[1], [0], [0], [1], [0, 0, 1, 1], [], []>} : vector<2x128xf32>, vector<128x128xf32>, vector<2x128xf32> -> vector<2x128xf32>
    %23 = arith.addf %21, %22 : vector<2x128xf32>
    %24 = math.tanh %23 : vector<2x128xf32>
    %25 = vector.extract_strided_slice %7 {offsets = [0, 3, 0], sizes = [2, 1, 128], strides = [1, 1, 1]} : vector<2x8x128xf32> to vector<2x1x128xf32>
    %26 = vector.shape_cast %25 : vector<2x1x128xf32> to vector<2x128xf32>
    %cst_12 = arith.constant dense<0.000000e+00> : vector<2x128xf32>
    %27 = tpu.matmul %24, %8, %cst_12 {dimension_numbers = #tpu.dot_dimension_numbers<[1], [0], [0], [1], [0, 0, 1, 1], [], []>} : vector<2x128xf32>, vector<128x128xf32>, vector<2x128xf32> -> vector<2x128xf32>
    %28 = arith.addf %26, %27 : vector<2x128xf32>
    %29 = math.tanh %28 : vector<2x128xf32>
    %30 = vector.extract_strided_slice %7 {offsets = [0, 4, 0], sizes = [2, 1, 128], strides = [1, 1, 1]} : vector<2x8x128xf32> to vector<2x1x128xf32>
    %31 = vector.shape_cast %30 : vector<2x1x128xf32> to vector<2x128xf32>
    %cst_13 = arith.constant dense<0.000000e+00> : vector<2x128xf32>
    %32 = tpu.matmul %29, %8, %cst_13 {dimension_numbers = #tpu.dot_dimension_numbers<[1], [0], [0], [1], [0, 0, 1, 1], [], []>} : vector<2x128xf32>, vector<128x128xf32>, vector<2x128xf32> -> vector<2x128xf32>
    %33 = arith.addf %31, %32 : vector<2x128xf32>
    %34 = math.tanh %33 : vector<2x128xf32>
    %35 = vector.extract_strided_slice %7 {offsets = [0, 5, 0], sizes = [2, 1, 128], strides = [1, 1, 1]} : vector<2x8x128xf32> to vector<2x1x128xf32>
    %36 = vector.shape_cast %35 : vector<2x1x128xf32> to vector<2x128xf32>
    %cst_14 = arith.constant dense<0.000000e+00> : vector<2x128xf32>
    %37 = tpu.matmul %34, %8, %cst_14 {dimension_numbers = #tpu.dot_dimension_numbers<[1], [0], [0], [1], [0, 0, 1, 1], [], []>} : vector<2x128xf32>, vector<128x128xf32>, vector<2x128xf32> -> vector<2x128xf32>
    %38 = arith.addf %36, %37 : vector<2x128xf32>
    %39 = math.tanh %38 : vector<2x128xf32>
    %40 = vector.extract_strided_slice %7 {offsets = [0, 6, 0], sizes = [2, 1, 128], strides = [1, 1, 1]} : vector<2x8x128xf32> to vector<2x1x128xf32>
    %41 = vector.shape_cast %40 : vector<2x1x128xf32> to vector<2x128xf32>
    %cst_15 = arith.constant dense<0.000000e+00> : vector<2x128xf32>
    %42 = tpu.matmul %39, %8, %cst_15 {dimension_numbers = #tpu.dot_dimension_numbers<[1], [0], [0], [1], [0, 0, 1, 1], [], []>} : vector<2x128xf32>, vector<128x128xf32>, vector<2x128xf32> -> vector<2x128xf32>
    %43 = arith.addf %41, %42 : vector<2x128xf32>
    %44 = math.tanh %43 : vector<2x128xf32>
    %45 = vector.extract_strided_slice %7 {offsets = [0, 7, 0], sizes = [2, 1, 128], strides = [1, 1, 1]} : vector<2x8x128xf32> to vector<2x1x128xf32>
    %46 = vector.shape_cast %45 : vector<2x1x128xf32> to vector<2x128xf32>
    %cst_16 = arith.constant dense<0.000000e+00> : vector<2x128xf32>
    %47 = tpu.matmul %44, %8, %cst_16 {dimension_numbers = #tpu.dot_dimension_numbers<[1], [0], [0], [1], [0, 0, 1, 1], [], []>} : vector<2x128xf32>, vector<128x128xf32>, vector<2x128xf32> -> vector<2x128xf32>
    %48 = arith.addf %46, %47 : vector<2x128xf32>
    %49 = math.tanh %48 : vector<2x128xf32>
    %c0_17 = arith.constant 0 : index
    %c0_18 = arith.constant 0 : index
    %50 = vector.load %arg4[%c0_17, %c0_18] : memref<128x128xf32, #tpu.memory_space<vmem>>, vector<128x128xf32>
    %cst_19 = arith.constant dense<0.000000e+00> : vector<2x128xf32>
    %51 = tpu.matmul %49, %50, %cst_19 {dimension_numbers = #tpu.dot_dimension_numbers<[1], [0], [0], [1], [0, 0, 1, 1], [], []>} : vector<2x128xf32>, vector<128x128xf32>, vector<2x128xf32> -> vector<2x128xf32>
    %c0_20 = arith.constant 0 : index
    %c0_21 = arith.constant 0 : index
    %52 = vector.load %arg5[%c0_20, %c0_21] : memref<1x128xf32, #tpu.memory_space<vmem>>, vector<1x128xf32>
    %53 = vector.broadcast %52 : vector<1x128xf32> to vector<2x128xf32>
    %54 = arith.addf %51, %53 : vector<2x128xf32>
    %c0_22 = arith.constant 0 : index
    %c0_23 = arith.constant 0 : index
    %55 = vector.load %arg6[%c0_22, %c0_23] : memref<2x128xf32, #tpu.memory_space<vmem>>, vector<2x128xf32>
    tpu.vector_store %arg6[%c0_22, %c0_23], %54 {strides = array<i32>} : memref<2x128xf32, #tpu.memory_space<vmem>>, vector<2x128xf32>,
    return
  }
}

</mosaic_0001>

<bundles_post_ra>
// kernel: vanilla_rnn_forward.1
= control target key start
LH: loop header
LB: loop body
LE: loop exit
PB: predicated region body
PF: predicated region fallthrough
CT: control target
= control target key end

     0   :  { %v1458_v1 = vmov 0.0   ;;  %vm1459_vm0 = vmmov 0   ;;  %vm35_vm1 = vcmask 130048   ;;  %s1964_s0 = inlined_call_operand.vmem [shape: f32[2,8,16], index: 0, kind: input, shape index: {}]   ;;  %s1965_s1 = inlined_call_operand.vmem [shape: f32[16,128], index: 1, kind: input, shape index: {}]   ;;  %s1966_s2 = inlined_call_operand.vmem [shape: f32[128,128], index: 2, kind: input, shape index: {}]   ;;  %s1967_s3 = inlined_call_operand.vmem [shape: f32[1,128], index: 3, kind: input, shape index: {}]   ;;  %s1968_s4 = inlined_call_operand.vmem [shape: f32[128,128], index: 4, kind: input, shape index: {}]   ;;  %s1969_s5 = inlined_call_operand.vmem [shape: f32[1,128], index: 5, kind: input, shape index: {}]   ;;  %s1970_s6 = inlined_call_operand.hbm [shape: f32[2,128], index: 6, kind: output, shape index: {}]  }
   0x1   :  { %v1499_v0 = vld [vmem:[%s1966_s2 + $0x78] sm:$0xff]  ;;  %1086 = vmatprep.subr.mxu1 %v1458_v1  ;;  %v1505_v2 = vld [vmem:[%s1966_s2 + $0x70] sm:$0xff]  ;;  %1118 = vmatprep.mubr.msk.f32.mxu1 %vm1459_vm0, %v1458_v1  ;;  %v1514_v3 = vld [vmem:[%s1966_s2 + $0x68] sm:$0xff] }
   0x2   :  { %1087 = vmatpush3.msra.mxu1 %v1499_v0  ;;  %v27_v4 = vld [vmem:[%s1965_s1 + $0x8] sm:$0xff]  ;;  %v26_v5 = vld [vmem:[%s1965_s1] sm:$0xff] }
   0x3   :  { %1088 = vmatprep.subr.mxu1 %v1458_v1  ;;  %v1527_v6 = vld [vmem:[%s1966_s2 + $0x60] sm:$0xff]  ;;  %1079 = vmatprep.subr.mxu0 %v27_v4 }
   0x4   :  { %1089 = vmatpush3.msra.mxu1 %v1505_v2  ;;  %1080 = vmatpush3.msra.mxu0 %v27_v4  ;;  %v24_v7 = vld [vmem:[%s1964_s0] sm:$0xff] }
   0x5   :  { %1090 = vmatprep.subr.mxu1 %v1458_v1 }
   0x6   :  { %1091 = vmatpush3.msra.mxu1 %v1514_v3 }
   0x7   :  { %11 = vsyncpa [#allocation3], 0  ;;  %1092 = vmatprep.subr.mxu1 %v1458_v1  ;;  %v1537_v8 = vld [vmem:[%s1966_s2 + $0x58] sm:$0xff]  ;;  %1081 = vmatprep.subr.mxu0 %v26_v5  ;;  %v25_v9 = vld [vmem:[%s1964_s0 + $0x8] sm:$0xff]  ;;  %vm214_vm2 = vcmask 1041409   ;;  %s1460_s15 = smov [#allocation2]  }
   0x8   :  { %1093 = vmatpush3.msra.mxu1 %v1527_v6  ;;  %1082 = vmatpush3.msra.mxu0 %v26_v5  ;;  %v1547_v10 = vld [vmem:[%s1966_s2 + $0x50] sm:$0xff]  ;;  %v1554_v11 = vld [vmem:[%s1966_s2 + $0x48] sm:$0xff]  ;;  %v1563_v12 = vld [vmem:[%s1966_s2 + $0x40] sm:$0xff]  ;;  %s910_s16 = sshll.u32 %s1460_s15, 4  ;;  %s911_s16 = int_to_ptr.vmem [resolvable:$true] %s910_s16 }
   0x9   :  { %1094 = vmatprep.subr.mxu1 %v1458_v1  ;;  %1083 = vmatprep.mubr.msk.f32.mxu0 %vm35_vm1, %v24_v7  ;;  %v1572_v13 = vld [vmem:[%s1966_s2 + $0x38] sm:$0xff]  ;;  %v1581_v14 = vld [vmem:[%s1966_s2 + $0x30] sm:$0xff]  ;;  %v1590_v15 = vld [vmem:[%s1966_s2 + $0x28] sm:$0xff]  ;;  %s1436_s17 = scalar_lea.vmem %s911_s16, 32  ;;  %p1441_p1 = scmp.lt.s32.totalorder %s911_s16, %s911_s16 }
   0xa   :  { %1095 = vmatpush3.msra.mxu1 %v1537_v8  ;;  %1084 = vmatmul.mubr.msk.f32.vlgmr.msra.gmra.mxu0 %vm35_vm1, %v25_v9  ;;  %v1599_v16 = vld [vmem:[%s1966_s2 + $0x20] sm:$0xff]  ;;  %v1608_v17 = vld [vmem:[%s1966_s2 + $0x18] sm:$0xff]  ;;  %v1617_v18 = vld [vmem:[%s1966_s2 + $0x10] sm:$0xff]  ;;  %p1437_p0 = scmp.ne.s32.totalorder %s911_s16, %s1436_s17  ;;  %p1442_p2 = scmp.lt.s32.totalorder %s1436_s17, %s1436_s17 }
   0xb   :  { %1096 = vmatprep.subr.mxu1 %v1458_v1  ;;  %1121 = vmatprep.subr.mxu0 %v1458_v1  ;;  %v1626_v19 = vld [vmem:[%s1966_s2 + $0x8] sm:$0xff]  ;;  %v1635_v20 = vld [vmem:[%s1966_s2] sm:$0xff] }
   0xc   :  { %1097 = vmatpush3.msra.mxu1 %v1547_v10  ;;  %1122 = vmatpush3.msra.mxu0 %v1499_v0  ;;  %v918_v22 = vld [vmem:[%s1967_s3] ss:$0 sm:$0xff]  ;;  %p1443_p3 = por %p1442_p2, %p1441_p1 }
   0xd   :  { %1098 = vmatprep.subr.mxu1 %v1458_v1  ;;  %1123 = vmatprep.subr.mxu0 %v1458_v1 }
   0xe   :  { %1099 = vmatpush3.msra.mxu1 %v1554_v11  ;;  %1124 = vmatpush3.msra.mxu0 %v1505_v2  ;;  %p1444_p4 = pnand %p1443_p3, %p1437_p0 }
   0xf   :  { %1100 = vmatprep.subr.mxu1 %v1458_v1  ;;  %1125 = vmatprep.subr.mxu0 %v1458_v1 }
  0x10   :  { %1101 = vmatpush3.msra.mxu1 %v1563_v12  ;;  %1126 = vmatpush3.msra.mxu0 %v1514_v3 }
  0x11   :  { %1102 = vmatprep.subr.mxu1 %v1458_v1  ;;  %1127 = vmatprep.subr.mxu0 %v1458_v1 }
  0x12   :  { %1103 = vmatpush3.msra.mxu1 %v1572_v13  ;;  %1128 = vmatpush3.msra.mxu0 %v1527_v6 }
  0x13   :  { %1104 = vmatprep.subr.mxu1 %v1458_v1  ;;  %1129 = vmatprep.subr.mxu0 %v1458_v1 }
  0x14   :  { %1105 = vmatpush3.msra.mxu1 %v1581_v14  ;;  %1130 = vmatpush3.msra.mxu0 %v1537_v8 }
  0x15   :  { %1106 = vmatprep.subr.mxu1 %v1458_v1  ;;  %1131 = vmatprep.subr.mxu0 %v1458_v1 }
  0x16   :  { %1107 = vmatpush3.msra.mxu1 %v1590_v15  ;;  %1132 = vmatpush3.msra.mxu0 %v1547_v10 }
  0x17   :  { %1108 = vmatprep.subr.mxu1 %v1458_v1  ;;  %1133 = vmatprep.subr.mxu0 %v1458_v1 }
  0x18   :  { %1109 = vmatpush3.msra.mxu1 %v1599_v16  ;;  %1134 = vmatpush3.msra.mxu0 %v1554_v11 }
  0x19   :  { %1110 = vmatprep.subr.mxu1 %v1458_v1  ;;  %1135 = vmatprep.subr.mxu0 %v1458_v1 }
  0x1a   :  { %1111 = vmatpush3.msra.mxu1 %v1608_v17  ;;  %1136 = vmatpush3.msra.mxu0 %v1563_v12 }
  0x1b   :  { %1112 = vmatprep.subr.mxu1 %v1458_v1  ;;  %1137 = vmatprep.subr.mxu0 %v1458_v1 }
  0x1c   :  { %1113 = vmatpush3.msra.mxu1 %v1617_v18  ;;  %1138 = vmatpush3.msra.mxu0 %v1572_v13 }
  0x1d   :  { %1114 = vmatprep.subr.mxu1 %v1458_v1  ;;  %1139 = vmatprep.subr.mxu0 %v1458_v1 }
  0x1e   :  { %1115 = vmatpush3.msra.mxu1 %v1626_v19  ;;  %1140 = vmatpush3.msra.mxu0 %v1581_v14 }
  0x1f   :  { %1116 = vmatprep.subr.mxu1 %v1458_v1  ;;  %1141 = vmatprep.subr.mxu0 %v1458_v1 }
  0x20   :  { %1117 = vmatpush3.msra.mxu1 %v1635_v20  ;;  %1142 = vmatpush3.msra.mxu0 %v1590_v15 }
  0x21   :  { %1119 = vmatmul.mubr.f32.vlgmr.msra.gmra.mxu1 %v1458_v1  ;;  %1143 = vmatprep.subr.mxu0 %v1458_v1 }
  0x22   :  { %1144 = vmatpush3.msra.mxu0 %v1599_v16  ;;  %1153 = vmatprep.mubr.msk.f32.mxu0 %vm1459_vm0, %v1458_v1 }
  0x23   :  { %1145 = vmatprep.subr.mxu0 %v1458_v1  ;;  %1156 = vmatprep.subr.mxu1 %v1458_v1 }
  0x24   :  { %1146 = vmatpush3.msra.mxu0 %v1608_v17  ;;  %1157 = vmatpush3.msra.mxu1 %v1499_v0 }
  0x25   :  { %1147 = vmatprep.subr.mxu0 %v1458_v1  ;;  %1158 = vmatprep.subr.mxu1 %v1458_v1 }
  0x26   :  { %1148 = vmatpush3.msra.mxu0 %v1617_v18  ;;  %1159 = vmatpush3.msra.mxu1 %v1505_v2 }
  0x27   :  { %1149 = vmatprep.subr.mxu0 %v1458_v1  ;;  %1160 = vmatprep.subr.mxu1 %v1458_v1 }
  0x28   :  { %1150 = vmatpush3.msra.mxu0 %v1626_v19  ;;  %1161 = vmatpush3.msra.mxu1 %v1514_v3 }
  0x29   :  { %1151 = vmatprep.subr.mxu0 %v1458_v1  ;;  %1162 = vmatprep.subr.mxu1 %v1458_v1 }
  0x2a   :  { %1152 = vmatpush3.msra.mxu0 %v1635_v20  ;;  %1163 = vmatpush3.msra.mxu1 %v1527_v6 }
  0x2b   :  { %1164 = vmatprep.subr.mxu1 %v1458_v1  ;;  %1188 = vmatprep.mubr.msk.f32.mxu1 %vm1459_vm0, %v1458_v1 }
  0x2c   :  { %1165 = vmatpush3.msra.mxu1 %v1537_v8  ;;  %1191 = vmatprep.subr.mxu0 %v1458_v1 }
  0x2d   :  { %1166 = vmatprep.subr.mxu1 %v1458_v1 }
  0x2e   :  { %1167 = vmatpush3.msra.mxu1 %v1547_v10 }
  0x2f   :  { %1168 = vmatprep.subr.mxu1 %v1458_v1 }
  0x30   :  { %1169 = vmatpush3.msra.mxu1 %v1554_v11 }
  0x31   :  { %1170 = vmatprep.subr.mxu1 %v1458_v1 }
  0x32   :  { %1171 = vmatpush3.msra.mxu1 %v1563_v12 }
  0x33   :  { %1172 = vmatprep.subr.mxu1 %v1458_v1 }
  0x34   :  { %1173 = vmatpush3.msra.mxu1 %v1572_v13 }
  0x35   :  { %1174 = vmatprep.subr.mxu1 %v1458_v1 }
  0x36   :  { %1175 = vmatpush3.msra.mxu1 %v1581_v14 }
  0x37   :  { %1176 = vmatprep.subr.mxu1 %v1458_v1 }
  0x38   :  { %1177 = vmatpush3.msra.mxu1 %v1590_v15 }
  0x39   :  { %1178 = vmatprep.subr.mxu1 %v1458_v1 }
  0x3a   :  { %1179 = vmatpush3.msra.mxu1 %v1599_v16 }
  0x3b   :  { %1180 = vmatprep.subr.mxu1 %v1458_v1 }
  0x3c   :  { %1181 = vmatpush3.msra.mxu1 %v1608_v17 }
  0x3d   :  { %1182 = vmatprep.subr.mxu1 %v1458_v1 }
  0x3e   :  { %1183 = vmatpush3.msra.mxu1 %v1617_v18 }
  0x3f   :  { %1184 = vmatprep.subr.mxu1 %v1458_v1 }
  0x40   :  { %1185 = vmatpush3.msra.mxu1 %v1626_v19 }
  0x41   :  { %1186 = vmatprep.subr.mxu1 %v1458_v1 }
  0x42   :  { %1187 = vmatpush3.msra.mxu1 %v1635_v20 }
  0x43   :  { %1226 = vmatprep.subr.mxu1 %v1458_v1 }
  0xca   :  { %v1085_v21 = vpop.f32.mrf.mxu0 }
  0xcb   :  { %v1696_v24 = vadd.f32 %v1085_v21, %v918_v22 }
  0xcc   :  { %v108_v23 = vpop.f32.mrf.mxu0 }
  0xcd   :  { %v1698_v25 = vadd.f32 %v918_v22, %v108_v23 }
  0xe1   :  { %v199_v26 = vpop.f32.mrf.mxu1 }
  0xe2   :  { %v204_v27 = vrot.slane %v199_v26, 1  ;;  %v207_v29 = vadd.f32 %v199_v26, %v1698_v25 }
  0xe3   :  { %v1120_v28 = vpop.f32.mrf.mxu1 }
  0xe4   :  { %v208_v30 = vadd.f32 %v204_v27, %v1696_v24 }
  0xe6   :  { %1404 = vtanh.f32 %v208_v30 }
  0xe7   :  { %1406 = vtanh.f32 %v207_v29 }
  0xf3   :  { %v1405_v31 = vpop.eup %1404 }
  0xf4   :  { %v213_v32 = vrot.slane %v1405_v31, 7  ;;  %v1407_v33 = vpop.eup %1406 }
  0xf6   :  { %v215_v34 = vsel %vm214_vm2, %v213_v32, %v1407_v33 }
  0xf7   :  { %1154 = vmatmul.mubr.f32.vlgmr.msra.gmra.mxu0 %v215_v34 }
  0xf8   :  { %1192 = vmatpush3.msra.mxu0 %v1499_v0  ;;  %1223 = vmatprep.mubr.msk.f32.mxu0 %vm1459_vm0, %v1458_v1 }
  0xf9   :  { %1193 = vmatprep.subr.mxu0 %v1458_v1 }
  0xfa   :  { %1194 = vmatpush3.msra.mxu0 %v1505_v2 }
  0xfb   :  { %1195 = vmatprep.subr.mxu0 %v1458_v1 }
  0xfc   :  { %1196 = vmatpush3.msra.mxu0 %v1514_v3 }
  0xfd   :  { %1197 = vmatprep.subr.mxu0 %v1458_v1 }
  0xfe   :  { %1198 = vmatpush3.msra.mxu0 %v1527_v6 }
  0xff   :  { %1199 = vmatprep.subr.mxu0 %v1458_v1 }
 0x100   :  { %1200 = vmatpush3.msra.mxu0 %v1537_v8 }
 0x101   :  { %1201 = vmatprep.subr.mxu0 %v1458_v1 }
 0x102   :  { %1202 = vmatpush3.msra.mxu0 %v1547_v10 }
 0x103   :  { %1203 = vmatprep.subr.mxu0 %v1458_v1 }
 0x104   :  { %1204 = vmatpush3.msra.mxu0 %v1554_v11 }
 0x105   :  { %1205 = vmatprep.subr.mxu0 %v1458_v1 }
 0x106   :  { %1206 = vmatpush3.msra.mxu0 %v1563_v12 }
 0x107   :  { %1207 = vmatprep.subr.mxu0 %v1458_v1 }
 0x108   :  { %1208 = vmatpush3.msra.mxu0 %v1572_v13 }
 0x109   :  { %1209 = vmatprep.subr.mxu0 %v1458_v1 }
 0x10a   :  { %1210 = vmatpush3.msra.mxu0 %v1581_v14 }
 0x10b   :  { %1211 = vmatprep.subr.mxu0 %v1458_v1 }
 0x10c   :  { %1212 = vmatpush3.msra.mxu0 %v1590_v15 }
 0x10d   :  { %1213 = vmatprep.subr.mxu0 %v1458_v1 }
 0x10e   :  { %1214 = vmatpush3.msra.mxu0 %v1599_v16 }
 0x10f   :  { %1215 = vmatprep.subr.mxu0 %v1458_v1 }
 0x110   :  { %1216 = vmatpush3.msra.mxu0 %v1608_v17 }
 0x111   :  { %1217 = vmatprep.subr.mxu0 %v1458_v1 }
 0x112   :  { %1218 = vmatpush3.msra.mxu0 %v1617_v18 }
 0x113   :  { %1219 = vmatprep.subr.mxu0 %v1458_v1 }
 0x114   :  { %1220 = vmatpush3.msra.mxu0 %v1626_v19 }
 0x115   :  { %1221 = vmatprep.subr.mxu0 %v1458_v1 }
 0x116   :  { %1222 = vmatpush3.msra.mxu0 %v1635_v20 }
 0x117   :  { %1261 = vmatprep.subr.mxu0 %v1458_v1 }
 0x1b7   :  { %v283_v35 = vpop.f32.mrf.mxu0 }
 0x1b8   :  { %v288_v36 = vrot.slane %v283_v35, 7  ;;  %v292_v39 = vadd.f32 %v283_v35, %v1696_v24 }
 0x1b9   :  { %v1155_v37 = vpop.f32.mrf.mxu0 }
 0x1ba   :  { %v291_v38 = vadd.f32 %v288_v36, %v1698_v25 }
 0x1bc   :  { %1408 = vtanh.f32 %v291_v38 }
 0x1bd   :  { %1410 = vtanh.f32 %v292_v39 }
 0x1c9   :  { %v1409_v40 = vpop.eup %1408 }
 0x1ca   :  { %v297_v41 = vrot.slane %v1409_v40, 1  ;;  %v1411_v42 = vpop.eup %1410 }
 0x1cc   :  { %v298_v43 = vsel %vm214_vm2, %v1411_v42, %v297_v41 }
 0x1cd   :  { %1189 = vmatmul.mubr.f32.vlgmr.msra.gmra.mxu1 %v298_v43  ;;  %v814_v43 = vld [vmem:[%s1968_s4 + $0x50] sm:$0xff] }
 0x1ce   :  { %1227 = vmatpush3.msra.mxu1 %v1499_v0  ;;  %1258 = vmatprep.mubr.msk.f32.mxu1 %vm1459_vm0, %v1458_v1 }
 0x1cf   :  { %1228 = vmatprep.subr.mxu1 %v1458_v1 }
 0x1d0   :  { %1229 = vmatpush3.msra.mxu1 %v1505_v2 }
 0x1d1   :  { %1230 = vmatprep.subr.mxu1 %v1458_v1 }
 0x1d2   :  { %1231 = vmatpush3.msra.mxu1 %v1514_v3 }
 0x1d3   :  { %1232 = vmatprep.subr.mxu1 %v1458_v1 }
 0x1d4   :  { %1233 = vmatpush3.msra.mxu1 %v1527_v6 }
 0x1d5   :  { %1234 = vmatprep.subr.mxu1 %v1458_v1 }
 0x1d6   :  { %1235 = vmatpush3.msra.mxu1 %v1537_v8 }
 0x1d7   :  { %1236 = vmatprep.subr.mxu1 %v1458_v1 }
 0x1d8   :  { %1237 = vmatpush3.msra.mxu1 %v1547_v10 }
 0x1d9   :  { %1238 = vmatprep.subr.mxu1 %v1458_v1 }
 0x1da   :  { %1239 = vmatpush3.msra.mxu1 %v1554_v11 }
 0x1db   :  { %1240 = vmatprep.subr.mxu1 %v1458_v1 }
 0x1dc   :  { %1241 = vmatpush3.msra.mxu1 %v1563_v12 }
 0x1dd   :  { %1242 = vmatprep.subr.mxu1 %v1458_v1 }
 0x1de   :  { %1243 = vmatpush3.msra.mxu1 %v1572_v13 }
 0x1df   :  { %1244 = vmatprep.subr.mxu1 %v1458_v1 }
 0x1e0   :  { %1245 = vmatpush3.msra.mxu1 %v1581_v14 }
 0x1e1   :  { %1246 = vmatprep.subr.mxu1 %v1458_v1 }
 0x1e2   :  { %1247 = vmatpush3.msra.mxu1 %v1590_v15 }
 0x1e3   :  { %1248 = vmatprep.subr.mxu1 %v1458_v1 }
 0x1e4   :  { %1249 = vmatpush3.msra.mxu1 %v1599_v16 }
 0x1e5   :  { %1250 = vmatprep.subr.mxu1 %v1458_v1 }
 0x1e6   :  { %1251 = vmatpush3.msra.mxu1 %v1608_v17 }
 0x1e7   :  { %1252 = vmatprep.subr.mxu1 %v1458_v1 }
 0x1e8   :  { %1253 = vmatpush3.msra.mxu1 %v1617_v18 }
 0x1e9   :  { %1254 = vmatprep.subr.mxu1 %v1458_v1 }
 0x1ea   :  { %1255 = vmatpush3.msra.mxu1 %v1626_v19 }
 0x1eb   :  { %1256 = vmatprep.subr.mxu1 %v1458_v1 }
 0x1ec   :  { %1257 = vmatpush3.msra.mxu1 %v1635_v20 }
 0x1ed   :  { %1296 = vmatprep.subr.mxu1 %v1458_v1 }
 0x28d   :  { %v366_v44 = vpop.f32.mrf.mxu1 }
 0x28e   :  { %v371_v45 = vrot.slane %v366_v44, 6  ;;  %v372_v46 = vrot.slane %v366_v44, 7  ;;  %v813_v44 = vld [vmem:[%s1968_s4 + $0x48] sm:$0xff] }
 0x28f   :  { %v1190_v47 = vpop.f32.mrf.mxu1 }
 0x290   :  { %v375_v48 = vadd.f32 %v371_v45, %v1698_v25  ;;  %v376_v49 = vadd.f32 %v372_v46, %v1696_v24  ;;  %v812_v45 = vld [vmem:[%s1968_s4 + $0x40] sm:$0xff]  ;;  %v811_v46 = vld [vmem:[%s1968_s4 + $0x38] sm:$0xff]  ;;  %v810_v47 = vld [vmem:[%s1968_s4 + $0x30] sm:$0xff] }
 0x292   :  { %1412 = vtanh.f32 %v375_v48  ;;  %v809_v48 = vld [vmem:[%s1968_s4 + $0x28] sm:$0xff] }
 0x293   :  { %1414 = vtanh.f32 %v376_v49  ;;  %v808_v49 = vld [vmem:[%s1968_s4 + $0x20] sm:$0xff] }
 0x29f   :  { %v1413_v50 = vpop.eup %1412 }
 0x2a0   :  { %v1415_v51 = vpop.eup %1414  ;;  %v381_v52 = vrot.slane %v1413_v50, 2  ;;  %v807_v50 = vld [vmem:[%s1968_s4 + $0x18] sm:$0xff] }
 0x2a1   :  { %v382_v53 = vrot.slane %v1415_v51, 1  ;;  %v806_v51 = vld [vmem:[%s1968_s4 + $0x10] sm:$0xff] }
 0x2a3   :  { %v383_v54 = vsel %vm214_vm2, %v382_v53, %v381_v52  ;;  %v805_v52 = vld [vmem:[%s1968_s4 + $0x8] sm:$0xff]  ;;  %v804_v53 = vld [vmem:[%s1968_s4] sm:$0xff] }
 0x2a4   :  { %1224 = vmatmul.mubr.f32.vlgmr.msra.gmra.mxu0 %v383_v54 }
 0x2a5   :  { %1262 = vmatpush3.msra.mxu0 %v1499_v0  ;;  %1293 = vmatprep.mubr.msk.f32.mxu0 %vm1459_vm0, %v1458_v1 }
 0x2a6   :  { %1263 = vmatprep.subr.mxu0 %v1458_v1 }
 0x2a7   :  { %1264 = vmatpush3.msra.mxu0 %v1505_v2 }
 0x2a8   :  { %1265 = vmatprep.subr.mxu0 %v1458_v1 }
 0x2a9   :  { %1266 = vmatpush3.msra.mxu0 %v1514_v3 }
 0x2aa   :  { %1267 = vmatprep.subr.mxu0 %v1458_v1 }
 0x2ab   :  { %1268 = vmatpush3.msra.mxu0 %v1527_v6 }
 0x2ac   :  { %1269 = vmatprep.subr.mxu0 %v1458_v1 }
 0x2ad   :  { %1270 = vmatpush3.msra.mxu0 %v1537_v8 }
 0x2ae   :  { %1271 = vmatprep.subr.mxu0 %v1458_v1 }
 0x2af   :  { %1272 = vmatpush3.msra.mxu0 %v1547_v10 }
 0x2b0   :  { %1273 = vmatprep.subr.mxu0 %v1458_v1 }
 0x2b1   :  { %1274 = vmatpush3.msra.mxu0 %v1554_v11 }
 0x2b2   :  { %1275 = vmatprep.subr.mxu0 %v1458_v1 }
 0x2b3   :  { %1276 = vmatpush3.msra.mxu0 %v1563_v12 }
 0x2b4   :  { %1277 = vmatprep.subr.mxu0 %v1458_v1 }
 0x2b5   :  { %1278 = vmatpush3.msra.mxu0 %v1572_v13 }
 0x2b6   :  { %1279 = vmatprep.subr.mxu0 %v1458_v1 }
 0x2b7   :  { %1280 = vmatpush3.msra.mxu0 %v1581_v14 }
 0x2b8   :  { %1281 = vmatprep.subr.mxu0 %v1458_v1 }
 0x2b9   :  { %1282 = vmatpush3.msra.mxu0 %v1590_v15 }
 0x2ba   :  { %1283 = vmatprep.subr.mxu0 %v1458_v1 }
 0x2bb   :  { %1284 = vmatpush3.msra.mxu0 %v1599_v16 }
 0x2bc   :  { %1285 = vmatprep.subr.mxu0 %v1458_v1 }
 0x2bd   :  { %1286 = vmatpush3.msra.mxu0 %v1608_v17 }
 0x2be   :  { %1287 = vmatprep.subr.mxu0 %v1458_v1 }
 0x2bf   :  { %1288 = vmatpush3.msra.mxu0 %v1617_v18 }
 0x2c0   :  { %1289 = vmatprep.subr.mxu0 %v1458_v1 }
 0x2c1   :  { %1290 = vmatpush3.msra.mxu0 %v1626_v19 }
 0x2c2   :  { %1291 = vmatprep.subr.mxu0 %v1458_v1 }
 0x2c3   :  { %1292 = vmatpush3.msra.mxu0 %v1635_v20 }
 0x2c4   :  { %1331 = vmatprep.subr.mxu0 %v1458_v1 }
 0x364   :  { %v451_v55 = vpop.f32.mrf.mxu0 }
 0x365   :  { %v456_v56 = vrot.slane %v451_v55, 5  ;;  %v457_v57 = vrot.slane %v451_v55, 6 }
 0x366   :  { %v1225_v58 = vpop.f32.mrf.mxu0 }
 0x367   :  { %v460_v59 = vadd.f32 %v456_v56, %v1698_v25  ;;  %v461_v60 = vadd.f32 %v457_v57, %v1696_v24 }
 0x369   :  { %1416 = vtanh.f32 %v460_v59 }
 0x36a   :  { %1418 = vtanh.f32 %v461_v60 }
 0x376   :  { %v1417_v61 = vpop.eup %1416 }
 0x377   :  { %v1419_v62 = vpop.eup %1418  ;;  %v466_v63 = vrot.slane %v1417_v61, 3 }
 0x378   :  { %v467_v4 = vrot.slane %v1419_v62, 2 }
 0x37a   :  { %v468_v5 = vsel %vm214_vm2, %v467_v4, %v466_v63 }
 0x37b   :  { %1259 = vmatmul.mubr.f32.vlgmr.msra.gmra.mxu1 %v468_v5 }
 0x37c   :  { %1297 = vmatpush3.msra.mxu1 %v1499_v0  ;;  %1328 = vmatprep.mubr.msk.f32.mxu1 %vm1459_vm0, %v1458_v1 }
 0x37d   :  { %1298 = vmatprep.subr.mxu1 %v1458_v1 }
 0x37e   :  { %1299 = vmatpush3.msra.mxu1 %v1505_v2 }
 0x37f   :  { %1300 = vmatprep.subr.mxu1 %v1458_v1 }
 0x380   :  { %1301 = vmatpush3.msra.mxu1 %v1514_v3 }
 0x381   :  { %1302 = vmatprep.subr.mxu1 %v1458_v1 }
 0x382   :  { %1303 = vmatpush3.msra.mxu1 %v1527_v6 }
 0x383   :  { %1304 = vmatprep.subr.mxu1 %v1458_v1 }
 0x384   :  { %1305 = vmatpush3.msra.mxu1 %v1537_v8 }
 0x385   :  { %1306 = vmatprep.subr.mxu1 %v1458_v1 }
 0x386   :  { %1307 = vmatpush3.msra.mxu1 %v1547_v10 }
 0x387   :  { %1308 = vmatprep.subr.mxu1 %v1458_v1 }
 0x388   :  { %1309 = vmatpush3.msra.mxu1 %v1554_v11 }
 0x389   :  { %1310 = vmatprep.subr.mxu1 %v1458_v1 }
 0x38a   :  { %1311 = vmatpush3.msra.mxu1 %v1563_v12 }
 0x38b   :  { %1312 = vmatprep.subr.mxu1 %v1458_v1 }
 0x38c   :  { %1313 = vmatpush3.msra.mxu1 %v1572_v13 }
 0x38d   :  { %1314 = vmatprep.subr.mxu1 %v1458_v1 }
 0x38e   :  { %1315 = vmatpush3.msra.mxu1 %v1581_v14 }
 0x38f   :  { %1316 = vmatprep.subr.mxu1 %v1458_v1 }
 0x390   :  { %1317 = vmatpush3.msra.mxu1 %v1590_v15 }
 0x391   :  { %1318 = vmatprep.subr.mxu1 %v1458_v1 }
 0x392   :  { %1319 = vmatpush3.msra.mxu1 %v1599_v16 }
 0x393   :  { %1320 = vmatprep.subr.mxu1 %v1458_v1 }
 0x394   :  { %1321 = vmatpush3.msra.mxu1 %v1608_v17 }
 0x395   :  { %1322 = vmatprep.subr.mxu1 %v1458_v1 }
 0x396   :  { %1323 = vmatpush3.msra.mxu1 %v1617_v18 }
 0x397   :  { %1324 = vmatprep.subr.mxu1 %v1458_v1 }
 0x398   :  { %1325 = vmatpush3.msra.mxu1 %v1626_v19 }
 0x399   :  { %1326 = vmatprep.subr.mxu1 %v1458_v1 }
 0x39a   :  { %1327 = vmatpush3.msra.mxu1 %v1635_v20 }
 0x39b   :  { %1366 = vmatprep.subr.mxu1 %v1458_v1 }
 0x43b   :  { %v536_v7 = vpop.f32.mrf.mxu1 }
 0x43c   :  { %v541_v9 = vrot.slane %v536_v7, 4  ;;  %v542_v21 = vrot.slane %v536_v7, 5 }
 0x43d   :  { %v1260_v22 = vpop.f32.mrf.mxu1 }
 0x43e   :  { %v545_v23 = vadd.f32 %v541_v9, %v1698_v25  ;;  %v546_v26 = vadd.f32 %v542_v21, %v1696_v24 }
 0x440   :  { %1420 = vtanh.f32 %v545_v23 }
 0x441   :  { %1422 = vtanh.f32 %v546_v26 }
 0x44d   :  { %v1421_v27 = vpop.eup %1420 }
 0x44e   :  { %v1423_v28 = vpop.eup %1422  ;;  %v551_v29 = vrot.slane %v1421_v27, 4 }
 0x44f   :  { %v552_v30 = vrot.slane %v1423_v28, 3 }
 0x451   :  { %v553_v31 = vsel %vm214_vm2, %v552_v30, %v551_v29 }
 0x452   :  { %1294 = vmatmul.mubr.f32.vlgmr.msra.gmra.mxu0 %v553_v31 }
 0x453   :  { %1332 = vmatpush3.msra.mxu0 %v1499_v0  ;;  %1363 = vmatprep.mubr.msk.f32.mxu0 %vm1459_vm0, %v1458_v1 }
 0x454   :  { %1333 = vmatprep.subr.mxu0 %v1458_v1 }
 0x455   :  { %1334 = vmatpush3.msra.mxu0 %v1505_v2 }
 0x456   :  { %1335 = vmatprep.subr.mxu0 %v1458_v1 }
 0x457   :  { %1336 = vmatpush3.msra.mxu0 %v1514_v3 }
 0x458   :  { %1337 = vmatprep.subr.mxu0 %v1458_v1 }
 0x459   :  { %1338 = vmatpush3.msra.mxu0 %v1527_v6 }
 0x45a   :  { %1339 = vmatprep.subr.mxu0 %v1458_v1 }
 0x45b   :  { %1340 = vmatpush3.msra.mxu0 %v1537_v8 }
 0x45c   :  { %1341 = vmatprep.subr.mxu0 %v1458_v1 }
 0x45d   :  { %1342 = vmatpush3.msra.mxu0 %v1547_v10 }
 0x45e   :  { %1343 = vmatprep.subr.mxu0 %v1458_v1 }
 0x45f   :  { %1344 = vmatpush3.msra.mxu0 %v1554_v11 }
 0x460   :  { %1345 = vmatprep.subr.mxu0 %v1458_v1 }
 0x461   :  { %1346 = vmatpush3.msra.mxu0 %v1563_v12 }
 0x462   :  { %1347 = vmatprep.subr.mxu0 %v1458_v1 }
 0x463   :  { %1348 = vmatpush3.msra.mxu0 %v1572_v13 }
 0x464   :  { %1349 = vmatprep.subr.mxu0 %v1458_v1 }
 0x465   :  { %1350 = vmatpush3.msra.mxu0 %v1581_v14 }
 0x466   :  { %1351 = vmatprep.subr.mxu0 %v1458_v1 }
 0x467   :  { %1352 = vmatpush3.msra.mxu0 %v1590_v15 }
 0x468   :  { %1353 = vmatprep.subr.mxu0 %v1458_v1 }
 0x469   :  { %1354 = vmatpush3.msra.mxu0 %v1599_v16  ;;  %v819_v16 = vld [vmem:[%s1968_s4 + $0x78] sm:$0xff] }
 0x46a   :  { %1355 = vmatprep.subr.mxu0 %v1458_v1 }
 0x46b   :  { %1356 = vmatpush3.msra.mxu0 %v1608_v17  ;;  %v818_v17 = vld [vmem:[%s1968_s4 + $0x70] sm:$0xff] }
 0x46c   :  { %1357 = vmatprep.subr.mxu0 %v1458_v1 }
 0x46d   :  { %1358 = vmatpush3.msra.mxu0 %v1617_v18  ;;  %v817_v18 = vld [vmem:[%s1968_s4 + $0x68] sm:$0xff] }
 0x46e   :  { %1359 = vmatprep.subr.mxu0 %v1458_v1 }
 0x46f   :  { %1360 = vmatpush3.msra.mxu0 %v1626_v19  ;;  %v816_v19 = vld [vmem:[%s1968_s4 + $0x60] sm:$0xff] }
 0x470   :  { %1361 = vmatprep.subr.mxu0 %v1458_v1 }
 0x471   :  { %1362 = vmatpush3.msra.mxu0 %v1635_v20  ;;  %v815_v20 = vld [vmem:[%s1968_s4 + $0x58] sm:$0xff] }
 0x512   :  { %v621_v0 = vpop.f32.mrf.mxu0 }
 0x513   :  { %v626_v2 = vrot.slane %v621_v0, 3  ;;  %v627_v3 = vrot.slane %v621_v0, 4 }
 0x514   :  { %v1295_v6 = vpop.f32.mrf.mxu0 }
 0x515   :  { %v630_v8 = vadd.f32 %v626_v2, %v1698_v25  ;;  %v631_v10 = vadd.f32 %v627_v3, %v1696_v24 }
 0x517   :  { %1424 = vtanh.f32 %v630_v8 }
 0x518   :  { %1426 = vtanh.f32 %v631_v10 }
 0x524   :  { %v1425_v11 = vpop.eup %1424 }
 0x525   :  { %v1427_v12 = vpop.eup %1426  ;;  %v636_v13 = vrot.slane %v1425_v11, 5 }
 0x526   :  { %v637_v14 = vrot.slane %v1427_v12, 4 }
 0x528   :  { %v638_v15 = vsel %vm214_vm2, %v637_v14, %v636_v13 }
 0x529   :  { %1329 = vmatmul.mubr.f32.vlgmr.msra.gmra.mxu1 %v638_v15 }
 0x52a   :  { %1398 = vmatprep.mubr.msk.f32.mxu1 %vm1459_vm0, %v1458_v1  ;;  %1367 = vmatpush3.msra.mxu1 %v819_v16 }
 0x52b   :  { %1368 = vmatprep.subr.mxu1 %v1458_v1 }
 0x52c   :  { %1369 = vmatpush3.msra.mxu1 %v818_v17 }
 0x52d   :  { %1370 = vmatprep.subr.mxu1 %v1458_v1 }
 0x52e   :  { %1371 = vmatpush3.msra.mxu1 %v817_v18 }
 0x52f   :  { %1372 = vmatprep.subr.mxu1 %v1458_v1 }
 0x530   :  { %1373 = vmatpush3.msra.mxu1 %v816_v19 }
 0x531   :  { %1374 = vmatprep.subr.mxu1 %v1458_v1 }
 0x532   :  { %1375 = vmatpush3.msra.mxu1 %v815_v20 }
 0x533   :  { %1376 = vmatprep.subr.mxu1 %v1458_v1 }
 0x534   :  { %1377 = vmatpush3.msra.mxu1 %v814_v43 }
 0x535   :  { %1378 = vmatprep.subr.mxu1 %v1458_v1 }
 0x536   :  { %1379 = vmatpush3.msra.mxu1 %v813_v44 }
 0x537   :  { %1380 = vmatprep.subr.mxu1 %v1458_v1 }
 0x538   :  { %1381 = vmatpush3.msra.mxu1 %v812_v45 }
 0x539   :  { %1382 = vmatprep.subr.mxu1 %v1458_v1 }
 0x53a   :  { %1383 = vmatpush3.msra.mxu1 %v811_v46 }
 0x53b   :  { %1384 = vmatprep.subr.mxu1 %v1458_v1 }
 0x53c   :  { %1385 = vmatpush3.msra.mxu1 %v810_v47 }
 0x53d   :  { %1386 = vmatprep.subr.mxu1 %v1458_v1 }
 0x53e   :  { %1387 = vmatpush3.msra.mxu1 %v809_v48 }
 0x53f   :  { %1388 = vmatprep.subr.mxu1 %v1458_v1 }
 0x540   :  { %1389 = vmatpush3.msra.mxu1 %v808_v49 }
 0x541   :  { %1390 = vmatprep.subr.mxu1 %v1458_v1 }
 0x542   :  { %1391 = vmatpush3.msra.mxu1 %v807_v50 }
 0x543   :  { %1392 = vmatprep.subr.mxu1 %v1458_v1 }
 0x544   :  { %1393 = vmatpush3.msra.mxu1 %v806_v51 }
 0x545   :  { %1394 = vmatprep.subr.mxu1 %v1458_v1 }
 0x546   :  { %1395 = vmatpush3.msra.mxu1 %v805_v52 }
 0x547   :  { %1396 = vmatprep.subr.mxu1 %v1458_v1  ;;  %v921_v1 = vld [vmem:[%s1969_s5] ss:$0 sm:$0xff] }
 0x548   :  { %1397 = vmatpush3.msra.mxu1 %v804_v53 }
 0x5e9   :  { %v706_v32 = vpop.f32.mrf.mxu1 }
 0x5ea   :  { %v711_v33 = vrot.slane %v706_v32, 2  ;;  %v712_v34 = vrot.slane %v706_v32, 3 }
 0x5eb   :  { %v1330_v35 = vpop.f32.mrf.mxu1 }
 0x5ec   :  { %v715_v36 = vadd.f32 %v711_v33, %v1698_v25  ;;  %v716_v37 = vadd.f32 %v712_v34, %v1696_v24 }
 0x5ee   :  { %1428 = vtanh.f32 %v715_v36 }
 0x5ef   :  { %1430 = vtanh.f32 %v716_v37 }
 0x5fb   :  { %v1429_v38 = vpop.eup %1428 }
 0x5fc   :  { %v1431_v39 = vpop.eup %1430  ;;  %v721_v40 = vrot.slane %v1429_v38, 6 }
 0x5fd   :  { %v722_v41 = vrot.slane %v1431_v39, 5 }
 0x5ff   :  { %v723_v42 = vsel %vm214_vm2, %v722_v41, %v721_v40 }
 0x600   :  { %1364 = vmatmul.mubr.f32.vlgmr.msra.gmra.mxu0 %v723_v42 }
 0x6c0   :  { %v791_v54 = vpop.f32.mrf.mxu0 }
 0x6c1   :  { %v796_v55 = vrot.slane %v791_v54, 1  ;;  %v797_v56 = vrot.slane %v791_v54, 2 }
 0x6c2   :  { %v1365_v57 = vpop.f32.mrf.mxu0 }
 0x6c3   :  { %v800_v58 = vadd.f32 %v796_v55, %v1698_v25  ;;  %v801_v59 = vadd.f32 %v797_v56, %v1696_v24 }
 0x6c5   :  { %1432 = vtanh.f32 %v800_v58 }
 0x6c6   :  { %1434 = vtanh.f32 %v801_v59 }
 0x6d2   :  { %v1433_v60 = vpop.eup %1432 }
 0x6d3   :  { %v1435_v61 = vpop.eup %1434  ;;  %v829_v62 = vrot.slane %v1433_v60, 7 }
 0x6d4   :  { %v830_v63 = vrot.slane %v1435_v61, 6 }
 0x6d6   :  { %v831_v4 = vsel %vm214_vm2, %v830_v63, %v829_v62 }
 0x6d7   :  { %1399 = vmatmul.mubr.f32.vlgmr.msra.gmra.mxu1 %v831_v4 }
 0x797   :  { %v899_v5 = vpop.f32.mrf.mxu1 }
 0x798   :  { %v900_v7 = vadd.f32 %v921_v1, %v899_v5 }
 0x799   :  { %v1400_v25 = vpop.f32.mrf.mxu1 }
 0x79a   :  { %903 = vst [vmem:[#allocation2] sm:$0x3] %v900_v7 }
 0x79b   :  { %1447 = shalt.err (!%p1444_p4)
}
 0x79c   :  { %913 = dma.vmem_to_hbm [thread:$0]  %s911_s16, 32, %s1970_s6, [#allocation3]  }
 0x79d   :  { %1456 = dma.done.wait [#allocation3], 32  }
 0x79e   :  { %1457 = vsyncadd [#allocation3], 4294967264 }
 0x79f   :  { %917 = vsyncpa [#allocation3], 1 }

</bundles_post_ra>
